<compile_context>
chip_gen: v5e
topology: v5e:2x2
jax: 0.10.0
libtpu: 0.0.40
codegen_flags: <defaults>
</compile_context>

<pallas_src>
import functools

import numpy as np
import jax
import jax.numpy as jnp
from jax.experimental import pallas as pl
from jax.experimental.pallas import tpu as pltpu

_LANE = 128
_GOLDEN = np.uint32(0x9E3779B9)


def _round_up(x: int, m: int) -> int:
    return (x + m - 1) // m * m


def _hash_u32(x):
    """murmur3-style finalizer on uint32 arrays (usable in-kernel and host-side)."""
    x = (x ^ (x >> 16)) * np.uint32(0x85EBCA6B)
    x = (x ^ (x >> 13)) * np.uint32(0xC2B2AE35)
    return x ^ (x >> 16)


def _dropout_threshold(p: float) -> np.uint32:
    # P(drop) = threshold / 2^32 == p  (integer compare, no uint->float convert).
    return np.uint32(min(int(round(p * (1 << 32))), (1 << 32) - 1))


# --------------------------------------------------------------------------- #
# Kernel
# --------------------------------------------------------------------------- #
def _mlp_kernel(seed_ref, x_ref, w1_ref, b1_ref, w2_ref, b2_ref, o_ref, acc_ref,
                *, dropout_p: float, training: bool,
                block_m: int, tile_ff: int, d_ff_p: int):
    k = pl.program_id(1)

    @pl.when(k == 0)
    def _init():
        acc_ref[...] = jnp.zeros_like(acc_ref)

    # hidden chunk = relu(x @ w1[:, k-th chunk] + b1_chunk); f32 MXU accumulation.
    xb = x_ref[...].astype(jnp.bfloat16)          # no-op if already bf16
    h = jnp.dot(xb, w1_ref[...], preferred_element_type=jnp.float32)
    h = jnp.maximum(h + b1_ref[...], 0.0)
    # Single early bf16 cast: dropout select + second matmul run on half-width data.
    h = h.astype(jnp.bfloat16)

    if training and dropout_p > 0.0:
        # Counter-based dropout mask: hash(global element index ^ seed).
        # Portable (no TPU-only PRNG primitive) and identical for any tiling.
        rows = jax.lax.broadcasted_iota(jnp.int32, h.shape, 0).astype(jnp.uint32)
        cols = jax.lax.broadcasted_iota(jnp.int32, h.shape, 1).astype(jnp.uint32)
        rows = rows + (pl.program_id(0) * block_m).astype(jnp.uint32)
        cols = cols + (k * tile_ff).astype(jnp.uint32)
        idx = rows * np.uint32(d_ff_p) + cols
        bits = _hash_u32(idx ^ (seed_ref[0].astype(jnp.uint32) * _GOLDEN))
        keep = bits >= _dropout_threshold(dropout_p)
        # keep-scale 1/(1-p) is folded into w2 in prepare_mlp_params -> plain select.
        h = jnp.where(keep, h, jnp.zeros_like(h))

    acc_ref[...] += jnp.dot(h, w2_ref[...], preferred_element_type=jnp.float32)

    @pl.when(k == pl.num_programs(1) - 1)
    def _finalize():
        o_ref[...] = (acc_ref[...] + b2_ref[...]).astype(o_ref.dtype)


# --------------------------------------------------------------------------- #
# Planning (tile sizes + VMEM budget)
# --------------------------------------------------------------------------- #
def _default_tile_m() -> int:
    try:
        kind = jax.devices()[0].device_kind.lower()
    except Exception:
        return 512
    return 256 if "v5" in kind else 512


def _vmem_estimate(tm, d_model_p, tk_ff, num_k, out_bytes, training):
    wbuf = 1 if num_k == 1 else 2          # weight chunks single-buffered when resident
    est = (
        2 * tm * d_model_p * 4             # x tiles (double-buffered, f32 worst case)
        + 2 * tm * d_model_p * out_bytes   # out tiles (double-buffered)
        + wbuf * 2 * d_model_p * tk_ff * 2  # w1 + w2 chunks (bf16)
        + wbuf * tk_ff * 4 + d_model_p * 4  # biases (f32)
        + tm * d_model_p * 4               # f32 accumulator scratch
        + tm * tk_ff * (4 + 2)             # hidden chunk: f32 + bf16 copy
    )
    if training:
        est += tm * tk_ff * (4 + 4 + 1)    # iota/hash u32 temporaries + keep mask
    return est


def plan_mlp(n_rows, d_model, d_ff, out_bytes, *, tile_m=None, tile_ff=None,
             training=False, vmem_budget=44 * 1024 * 1024):
    d_model_p = _round_up(d_model, _LANE)
    d_ff_p0 = _round_up(d_ff, _LANE)

    tm = tile_m if tile_m is not None else _default_tile_m()
    tm = max(16, min(int(tm), _round_up(n_rows, 16)))
    tm = _round_up(tm, 16)
    # Keep >= 2 row tiles when there is real work (megacore on v7x, DMA overlap).
    if n_rows > 256 and n_rows <= tm:
        tm = _round_up((n_rows + 1) // 2, 16)
    n_p = _round_up(n_rows, tm)

    if tile_ff is not None:
        tk = _round_up(min(int(tile_ff), d_ff_p0), _LANE)
    else:
        # Stream d_ff in the largest chunk that fits the VMEM budget; small d_ff
        # stays fully resident (num_k == 1 -> single-buffered weights).
        tk = d_ff_p0
        while tk > _LANE:
            nk = _round_up(d_ff_p0, tk) // tk
            if _vmem_estimate(tm, d_model_p, tk, nk, out_bytes, training) <= vmem_budget:
                break
            tk = _round_up(tk // 2, _LANE)
    d_ff_p = _round_up(d_ff_p0, tk)
    num_k = d_ff_p // tk
    est = _vmem_estimate(tm, d_model_p, tk, num_k, out_bytes, training)
    vmem_limit = int(min(64 * 1024 * 1024,
                         max(16 * 1024 * 1024, _round_up(est + (4 << 20), 1 << 20))))
    return dict(tm=tm, n_p=n_p, d_model_p=d_model_p, d_ff_p=d_ff_p,
                tk_ff=tk, num_k=num_k, vmem_limit=vmem_limit)


# --------------------------------------------------------------------------- #
# Parameter preparation (call once, reuse across forwards)
# --------------------------------------------------------------------------- #
def prepare_mlp_params(w1, b1, w2, b2, plan, *, dropout_p=0.1, training=False):
    """w1: [d_model, d_ff], w2: [d_ff, d_model] (pre-transposed vs torch Linear)."""
    d_model, d_ff = w1.shape
    dmp, dfp = plan["d_model_p"], plan["d_ff_p"]
    w1_p = jnp.pad(w1.astype(jnp.bfloat16), ((0, dmp - d_model), (0, dfp - d_ff)))
    w2f = w2.astype(jnp.float32)
    if training and dropout_p > 0.0:
        # Fold inverted-dropout keep scale into w2: (h*s)@w2 == h@(s*w2).
        w2f = w2f * (1.0 / (1.0 - dropout_p))
    w2_p = jnp.pad(w2f.astype(jnp.bfloat16), ((0, dfp - d_ff), (0, dmp - d_model)))
    b1_p = jnp.pad(b1.astype(jnp.float32), (0, dfp - d_ff)).reshape(1, dfp)
    b2_p = jnp.pad(b2.astype(jnp.float32), (0, dmp - d_model)).reshape(1, dmp)
    return w1_p, b1_p, w2_p, b2_p


# --------------------------------------------------------------------------- #
# Forward
# --------------------------------------------------------------------------- #
def mlp_pallas_apply(x, params, plan, *, dropout_p=0.1, training=False, seed=0):
    w1_p, b1_p, w2_p, b2_p = params
    orig_shape = x.shape
    d_model = orig_shape[-1]
    x2d = x.reshape(-1, d_model)
    n = x2d.shape[0]

    tm, n_p, dmp, dfp, tk, num_k, vmem_limit = (
        plan[s] for s in ("tm", "n_p", "d_model_p", "d_ff_p", "tk_ff",
                          "num_k", "vmem_limit"))
    assert n_p >= n and n_p % tm == 0 and dfp % tk == 0

    if n_p != n or dmp != d_model:
        # Zero padding is mathematically a no-op (sliced off below).
        xk = jnp.pad(x2d.astype(jnp.bfloat16), ((0, n_p - n), (0, dmp - d_model)))
    else:
        xk = x2d  # aligned fast path: no wrapper pad/copy; cast to bf16 on-chip

    seed_arr = jnp.asarray([seed], dtype=jnp.int32)
    kernel = functools.partial(
        _mlp_kernel, dropout_p=float(dropout_p), training=bool(training),
        block_m=tm, tile_ff=tk, d_ff_p=dfp)

    # Weights/biases that never change across the grid only need one buffer.
    w_mode = pl.Buffered(1) if num_k == 1 else None

    out = pl.pallas_call(
        kernel,
        out_shape=jax.ShapeDtypeStruct((n_p, dmp), x.dtype),
        grid=(n_p // tm, num_k),
        in_specs=[
            pl.BlockSpec(memory_space=pltpu.MemorySpace.SMEM),                 # seed
            pl.BlockSpec((tm, dmp), lambda i, k: (i, 0)),                      # x row tile
            pl.BlockSpec((dmp, tk), lambda i, k: (0, k), pipeline_mode=w_mode),  # w1 chunk
            pl.BlockSpec((1, tk), lambda i, k: (0, k), pipeline_mode=w_mode),    # b1 chunk
            pl.BlockSpec((tk, dmp), lambda i, k: (k, 0), pipeline_mode=w_mode),  # w2 chunk
            pl.BlockSpec((1, dmp), lambda i, k: (0, 0),
                         pipeline_mode=pl.Buffered(1)),                        # b2 (resident)
        ],
        out_specs=pl.BlockSpec((tm, dmp), lambda i, k: (i, 0)),
        scratch_shapes=[pltpu.VMEM((tm, dmp), jnp.float32)],                   # f32 accumulator
        compiler_params=pltpu.CompilerParams(
            dimension_semantics=("parallel", "arbitrary"),
            vmem_limit_bytes=vmem_limit),
    )(seed_arr, xk, w1_p, b1_p, w2_p, b2_p)

    if n_p != n or dmp != d_model:
        out = out[:n, :d_model]
    return out.reshape(orig_shape)


def mlp_pallas(x, w1, b1, w2, b2, *, dropout_p=0.1, training=False, seed=0,
               tile_m=None, tile_ff=None):
    """Convenience wrapper: plan + prepare + apply in one call."""
    n = int(np.prod(x.shape[:-1])) if x.ndim > 1 else 1
    plan = plan_mlp(n, x.shape[-1], w1.shape[1], jnp.dtype(x.dtype).itemsize,
                    tile_m=tile_m, tile_ff=tile_ff,
                    training=training and dropout_p > 0.0)
    params = prepare_mlp_params(w1, b1, w2, b2, plan,
                                dropout_p=dropout_p, training=training)
    return mlp_pallas_apply(x, params, plan, dropout_p=dropout_p,
                            training=training, seed=seed)


# --------------------------------------------------------------------------- #
# Demo / self-test
# --------------------------------------------------------------------------- #
if __name__ == "__main__":
    batch, seq, d_model, d_ff = 2, 8, 32, 64
    dropout_p = 0.1
    key = jax.random.PRNGKey(0)
    kx, k1, kb1, k2, kb2 = jax.random.split(key, 5)

    x = jax.random.normal(kx, (batch, seq, d_model), dtype=jnp.float32)
    # PyTorch nn.Linear weights are [out, in]; the kernel takes them pre-transposed.
    w1 = (jax.random.normal(k1, (d_ff, d_model), dtype=jnp.float32) * 0.05).T  # [d_model, d_ff]
    b1 = jax.random.normal(kb1, (d_ff,), dtype=jnp.float32) * 0.05
    w2 = (jax.random.normal(k2, (d_model, d_ff), dtype=jnp.float32) * 0.05).T  # [d_ff, d_model]
    b2 = jax.random.normal(kb2, (d_model,), dtype=jnp.float32) * 0.05

    n = batch * seq
    plan = plan_mlp(n, d_model, d_ff, jnp.dtype(x.dtype).itemsize, training=True)
    # Padded/cast weights prepared once (hoisted out of the per-call path).
    params_eval = prepare_mlp_params(w1, b1, w2, b2, plan,
                                     dropout_p=dropout_p, training=False)
    params_train = prepare_mlp_params(w1, b1, w2, b2, plan,
                                      dropout_p=dropout_p, training=True)

    # ---------------- eval mode (dropout identity, matches module.eval()) ----
    out = mlp_pallas_apply(x, params_eval, plan, dropout_p=dropout_p, training=False)
    out = jax.block_until_ready(out)
    assert out.shape == (batch, seq, d_model)

    xb = x.reshape(-1, d_model).astype(jnp.bfloat16)
    h_ref = jnp.dot(xb, w1.astype(jnp.bfloat16),
                    preferred_element_type=jnp.float32) + b1
    h_ref = jnp.maximum(h_ref, 0.0)
    ref = jnp.dot(h_ref.astype(jnp.bfloat16), w2.astype(jnp.bfloat16),
                  preferred_element_type=jnp.float32) + b2
    ref = ref.reshape(batch, seq, d_model)
    assert jnp.allclose(out, ref, atol=1e-2, rtol=1e-2), "eval mismatch vs reference"

    # ---------------- training mode (dropout active) --------------------------
    seed = 7
    out_tr = mlp_pallas_apply(x, params_train, plan, dropout_p=dropout_p,
                              training=True, seed=seed)
    out_tr = jax.block_until_ready(out_tr)
    assert bool(jnp.all(jnp.isfinite(out_tr)))

    # Host-side reference reproducing the kernel's counter-based mask exactly.
    rows = jnp.arange(n, dtype=jnp.uint32)[:, None]
    cols = jnp.arange(d_ff, dtype=jnp.uint32)[None, :]
    idx = rows * np.uint32(plan["d_ff_p"]) + cols
    bits = _hash_u32(idx ^ (jnp.asarray(seed, jnp.uint32) * _GOLDEN))
    keep = bits >= _dropout_threshold(dropout_p)
    hb = h_ref.astype(jnp.bfloat16)
    h_drop = jnp.where(keep, hb, jnp.zeros_like(hb))
    w2_scaled = (w2.astype(jnp.float32) * (1.0 / (1.0 - dropout_p))).astype(jnp.bfloat16)
    ref_tr = (jnp.dot(h_drop, w2_scaled, preferred_element_type=jnp.float32)
              + b2).reshape(batch, seq, d_model)
    assert jnp.allclose(out_tr, ref_tr, atol=1e-2, rtol=1e-2), "train mismatch vs reference"

    print("KERNEL_OK")
</pallas_src>

<mosaic_0001>
module attributes {stable_mosaic.version = 11 : i64} {
  func.func @_mlp_kernel(%arg0: i32, %arg1: i32, %arg2: memref<1xi32, #tpu.memory_space<smem>>, %arg3: memref<16x128xbf16, #tpu.memory_space<vmem>>, %arg4: memref<128x128xbf16, #tpu.memory_space<vmem>>, %arg5: memref<1x128xf32, #tpu.memory_space<vmem>>, %arg6: memref<128x128xbf16, #tpu.memory_space<vmem>>, %arg7: memref<1x128xf32, #tpu.memory_space<vmem>>, %arg8: memref<16x128xf32, #tpu.memory_space<vmem>>, %arg9: memref<16x128xf32, #tpu.memory_space<vmem>>) attributes {dimension_semantics = [#tpu.dimension_semantics<parallel>, #tpu.dimension_semantics<arbitrary>], iteration_bounds = array<i64: 1, 1>, scalar_prefetch = 0 : i64, scratch_operands = 1 : i64, tpu.core_type = #tpu.core_type<tc>, window_params = [{transform_indices = @transform_0, window_bounds = array<i64: 1>}, {transform_indices = @transform_1, window_bounds = array<i64: 16, 128>}, {pipeline_mode = #tpu.pipeline_mode<synchronous>, transform_indices = @transform_2, window_bounds = array<i64: 128, 128>}, {pipeline_mode = #tpu.pipeline_mode<synchronous>, transform_indices = @transform_3, window_bounds = array<i64: 1, 128>}, {pipeline_mode = #tpu.pipeline_mode<synchronous>, transform_indices = @transform_4, window_bounds = array<i64: 128, 128>}, {pipeline_mode = #tpu.pipeline_mode<synchronous>, transform_indices = @transform_5, window_bounds = array<i64: 1, 128>}, {transform_indices = @transform_6, window_bounds = array<i64: 16, 128>}]} {
    %c0_i32 = arith.constant 0 : i32
    %0 = arith.cmpi eq, %arg1, %c0_i32 : i32
    %1 = arith.extui %0 : i1 to i32
    %c0_i32_0 = arith.constant 0 : i32
    %2 = arith.cmpi ne, %1, %c0_i32_0 : i32
    scf.if %2 {
      %cst_16 = arith.constant 0.000000e+00 : f32
      %20 = vector.broadcast %cst_16 : f32 to vector<16x128xf32>
      %c0_17 = arith.constant 0 : index
      %c0_18 = arith.constant 0 : index
      %21 = vector.load %arg9[%c0_17, %c0_18] : memref<16x128xf32, #tpu.memory_space<vmem>>, vector<16x128xf32>
      tpu.vector_store %arg9[%c0_17, %c0_18], %20 {strides = array<i32>} : memref<16x128xf32, #tpu.memory_space<vmem>>, vector<16x128xf32>,
    } else {
    }
    %c0 = arith.constant 0 : index
    %c0_1 = arith.constant 0 : index
    %3 = vector.load %arg3[%c0, %c0_1] : memref<16x128xbf16, #tpu.memory_space<vmem>>, vector<16x128xbf16>
    %c0_2 = arith.constant 0 : index
    %c0_3 = arith.constant 0 : index
    %4 = vector.load %arg4[%c0_2, %c0_3] : memref<128x128xbf16, #tpu.memory_space<vmem>>, vector<128x128xbf16>
    %cst = arith.constant dense<0.000000e+00> : vector<16x128xf32>
    %5 = tpu.matmul %3, %4, %cst {dimension_numbers = #tpu.dot_dimension_numbers<[1], [0], [0], [1], [0, 0, 1, 1], [], []>} : vector<16x128xbf16>, vector<128x128xbf16>, vector<16x128xf32> -> vector<16x128xf32>
    %c0_4 = arith.constant 0 : index
    %c0_5 = arith.constant 0 : index
    %6 = vector.load %arg5[%c0_4, %c0_5] : memref<1x128xf32, #tpu.memory_space<vmem>>, vector<1x128xf32>
    %7 = vector.broadcast %6 : vector<1x128xf32> to vector<16x128xf32>
    %8 = arith.addf %5, %7 : vector<16x128xf32>
    %cst_6 = arith.constant 0.000000e+00 : f32
    %9 = vector.broadcast %cst_6 : f32 to vector<16x128xf32>
    %10 = arith.maximumf %8, %9 : vector<16x128xf32>
    %11 = arith.truncf %10 : vector<16x128xf32> to vector<16x128xbf16>
    %c0_7 = arith.constant 0 : index
    %c0_8 = arith.constant 0 : index
    %12 = vector.load %arg9[%c0_7, %c0_8] : memref<16x128xf32, #tpu.memory_space<vmem>>, vector<16x128xf32>
    %c0_9 = arith.constant 0 : index
    %c0_10 = arith.constant 0 : index
    %13 = vector.load %arg6[%c0_9, %c0_10] : memref<128x128xbf16, #tpu.memory_space<vmem>>, vector<128x128xbf16>
    %cst_11 = arith.constant dense<0.000000e+00> : vector<16x128xf32>
    %14 = tpu.matmul %11, %13, %cst_11 {dimension_numbers = #tpu.dot_dimension_numbers<[1], [0], [0], [1], [0, 0, 1, 1], [], []>} : vector<16x128xbf16>, vector<128x128xbf16>, vector<16x128xf32> -> vector<16x128xf32>
    %15 = arith.addf %12, %14 : vector<16x128xf32>
    %c0_12 = arith.constant 0 : index
    %c0_13 = arith.constant 0 : index
    %16 = vector.load %arg9[%c0_12, %c0_13] : memref<16x128xf32, #tpu.memory_space<vmem>>, vector<16x128xf32>
    tpu.vector_store %arg9[%c0_12, %c0_13], %15 {strides = array<i32>} : memref<16x128xf32, #tpu.memory_space<vmem>>, vector<16x128xf32>,
    %c0_i32_14 = arith.constant 0 : i32
    %17 = arith.cmpi eq, %arg1, %c0_i32_14 : i32
    %18 = arith.extui %17 : i1 to i32
    %c0_i32_15 = arith.constant 0 : i32
    %19 = arith.cmpi ne, %18, %c0_i32_15 : i32
    scf.if %19 {
      %c0_16 = arith.constant 0 : index
      %c0_17 = arith.constant 0 : index
      %20 = vector.load %arg9[%c0_16, %c0_17] : memref<16x128xf32, #tpu.memory_space<vmem>>, vector<16x128xf32>
      %c0_18 = arith.constant 0 : index
      %c0_19 = arith.constant 0 : index
      %21 = vector.load %arg7[%c0_18, %c0_19] : memref<1x128xf32, #tpu.memory_space<vmem>>, vector<1x128xf32>
      %22 = vector.broadcast %21 : vector<1x128xf32> to vector<16x128xf32>
      %23 = arith.addf %20, %22 : vector<16x128xf32>
      %c0_20 = arith.constant 0 : index
      %c0_21 = arith.constant 0 : index
      %24 = vector.load %arg8[%c0_20, %c0_21] : memref<16x128xf32, #tpu.memory_space<vmem>>, vector<16x128xf32>
      tpu.vector_store %arg8[%c0_20, %c0_21], %23 {strides = array<i32>} : memref<16x128xf32, #tpu.memory_space<vmem>>, vector<16x128xf32>,
    } else {
    }
    return
  }
  func.func @transform_0(%arg0: i32, %arg1: i32) -> i32 {
    %c0_i32 = arith.constant 0 : i32
    %c0_i32_0 = arith.constant 0 : i32
    return %c0_i32 : i32
  }
  func.func @transform_1(%arg0: i32, %arg1: i32) -> (i32, i32) {
    %c0_i32 = arith.constant 0 : i32
    %c0_i32_0 = arith.constant 0 : i32
    return %arg0, %c0_i32 : i32, i32
  }
  func.func @transform_2(%arg0: i32, %arg1: i32) -> (i32, i32) {
    %c0_i32 = arith.constant 0 : i32
    %c0_i32_0 = arith.constant 0 : i32
    return %c0_i32, %arg1 : i32, i32
  }
  func.func @transform_3(%arg0: i32, %arg1: i32) -> (i32, i32) {
    %c0_i32 = arith.constant 0 : i32
    %c0_i32_0 = arith.constant 0 : i32
    return %c0_i32, %arg1 : i32, i32
  }
  func.func @transform_4(%arg0: i32, %arg1: i32) -> (i32, i32) {
    %c0_i32 = arith.constant 0 : i32
    %c0_i32_0 = arith.constant 0 : i32
    return %arg1, %c0_i32 : i32, i32
  }
  func.func @transform_5(%arg0: i32, %arg1: i32) -> (i32, i32) {
    %c0_i32 = arith.constant 0 : i32
    %c0_i32_0 = arith.constant 0 : i32
    %c0_i32_1 = arith.constant 0 : i32
    return %c0_i32, %c0_i32_0 : i32, i32
  }
  func.func @transform_6(%arg0: i32, %arg1: i32) -> (i32, i32) {
    %c0_i32 = arith.constant 0 : i32
    %c0_i32_0 = arith.constant 0 : i32
    return %arg0, %c0_i32 : i32, i32
  }
}

</mosaic_0001>

<bundles_post_ra>
// kernel: tpu_custom_call.1
= control target key start
LH: loop header
LB: loop body
LE: loop exit
PB: predicated region body
PF: predicated region fallthrough
CT: control target
= control target key end

     0   :  { %12 = vsyncpa [#allocation5], 0  ;;  %s546_s0 = inlined_call_operand.<no memory space> [shape: s32[1], index: 0, kind: input, shape index: {}]   ;;  %s547_s1 = inlined_call_operand.hbm [shape: bf16[16,128], index: 1, kind: input, shape index: {}]   ;;  %s548_s2 = inlined_call_operand.hbm [shape: bf16[128,128], index: 2, kind: input, shape index: {}]   ;;  %s549_s3 = inlined_call_operand.vmem [shape: f32[1,128], index: 3, kind: input, shape index: {}]   ;;  %s550_s4 = inlined_call_operand.hbm [shape: bf16[128,128], index: 4, kind: input, shape index: {}]   ;;  %s551_s5 = inlined_call_operand.vmem [shape: f32[1,128], index: 5, kind: input, shape index: {}]   ;;  %s552_s6 = inlined_call_operand.hbm [shape: f32[16,128], index: 6, kind: output, shape index: {}]  }
   0x1   :  { %13 = vsyncpa [#allocation8], 0 }
   0x2   :  { %14 = vsyncpa [#allocation6], 0  ;;  %s34_s22 = sshll.u32 %s548_s2, 4  ;;  %s485_s23 = smov [#allocation7]   ;;  %s35_s22 = int_to_ptr.hbm [resolvable:$true] %s34_s22 }
   0x3   :  { %s36_s24 = sshll.u32 %s485_s23, 4  ;;  %s21_s27 = sshll.u32 %s547_s1, 4  ;;  %s37_s24 = int_to_ptr.vmem [resolvable:$true] %s36_s24  ;;  %s22_s27 = int_to_ptr.hbm [resolvable:$true] %s21_s27 }
   0x4   :  { %s486_s28 = smov 64   ;;  %s487_s29 = smov 4  }
   0x5   :  { %42 = dma.hbm_to_vmem [thread:$0]  %s35_s22, 1024, %s37_s24, [#allocation8], %s486_s28, %s486_s28, %s487_s29  }
   0x6   :  { %s488_s30 = smov [#allocation4]   ;;  %s49_s10 = sshll.u32 %s550_s4, 4  ;;  %s50_s10 = int_to_ptr.hbm [resolvable:$true] %s49_s10 }
   0x7   :  { %s23_s7 = sshll.u32 %s488_s30, 4  ;;  %s489_s2 = smov [#allocation9]   ;;  %s24_s7 = int_to_ptr.vmem [resolvable:$true] %s23_s7 }
   0x8   :  { %29 = dma.hbm_to_vmem [thread:$0]  %s22_s27, 128, %s24_s7, [#allocation5], %s486_s28, %s486_s28, %s487_s29  }
   0x9   :  { %s51_s11 = sshll.u32 %s489_s2, 4  ;;  %s52_s11 = int_to_ptr.vmem [resolvable:$true] %s51_s11 }
   0xa   :  { %57 = dma.hbm_to_vmem [thread:$0]  %s50_s10, 1024, %s52_s11, [#allocation8], %s486_s28, %s486_s28, %s487_s29  }
   0xb   :  { %479 = dma.done.wait [#allocation5], 128  }
   0xc   :  { %480 = vsyncadd [#allocation5], 4294967168 }
   0xd   :  { %481 = dma.done.wait [#allocation8], 2048  }
   0xe   :  { %482 = vsyncadd [#allocation8], 4294965248  ;;  %v364_v0 = vld [vmem:[#allocation7 + $0x38] sm:$0xff]  ;;  %v363_v1 = vld [vmem:[#allocation7 + $0x30] sm:$0xff]  ;;  %s490_s14 = smov [#allocation10]   ;;  %s491_s18 = smov 128  }
   0xf   :  { %154 = vmatpush.bf16.msra.mxu0 %v364_v0  ;;  %v372_v2 = vld [vmem:[#allocation9 + $0x38] sm:$0xff]  ;;  %v371_v3 = vld [vmem:[#allocation9 + $0x30] sm:$0xff]  ;;  %v362_v4 = vld [vmem:[#allocation7 + $0x28] sm:$0xff]  ;;  %s272_s15 = sshll.u32 %s490_s14, 4  ;;  %s492_s19 = smov 8   ;;  %s273_s15 = int_to_ptr.vmem [resolvable:$true] %s272_s15 }
  0x10   :  { %237 = vmatpush.bf16.msra.mxu1 %v372_v2  ;;  %v370_v5 = vld [vmem:[#allocation9 + $0x28] sm:$0xff]  ;;  %v361_v6 = vld [vmem:[#allocation7 + $0x20] sm:$0xff]  ;;  %v360_v8 = vld [vmem:[#allocation7 + $0x18] sm:$0xff] }
  0x11   :  { %v369_v7 = vld [vmem:[#allocation9 + $0x20] sm:$0xff]  ;;  %v359_v9 = vld [vmem:[#allocation7 + $0x10] sm:$0xff]  ;;  %v358_v10 = vld [vmem:[#allocation7 + $0x8] sm:$0xff] }
  0x12   :  { %v357_v11 = vld [vmem:[#allocation7] sm:$0xff]  ;;  %v356_v12 = vld [vmem:[#allocation4] sm:$0xff]  ;;  %v367_v14 = vld [vmem:[#allocation9 + $0x10] sm:$0xff] }
  0x13   :  { %155 = vmatpush.bf16.msra.mxu0 %v363_v1  ;;  %v368_v13 = vld [vmem:[#allocation9 + $0x18] sm:$0xff]  ;;  %v366_v15 = vld [vmem:[#allocation9 + $0x8] sm:$0xff]  ;;  %v365_v16 = vld [vmem:[#allocation9] sm:$0xff] }
  0x14   :  { %238 = vmatpush.bf16.msra.mxu1 %v371_v3  ;;  %v381_v18 = vld [vmem:[%s549_s3] ss:$0 sm:$0xff]  ;;  %s274_s3 = sshll.u32 %s552_s6, 4  ;;  %s275_s3 = int_to_ptr.hbm [resolvable:$true] %s274_s3 }
  0x15   :  { %v382_v25 = vld [vmem:[%s551_s5] ss:$0 sm:$0xff] }
  0x17   :  { %156 = vmatpush.bf16.msra.mxu0 %v362_v4 }
  0x18   :  { %239 = vmatpush.bf16.msra.mxu1 %v370_v5 }
  0x1b   :  { %157 = vmatpush.bf16.msra.mxu0 %v361_v6 }
  0x1c   :  { %240 = vmatpush.bf16.msra.mxu1 %v369_v7 }
  0x1f   :  { %158 = vmatpush.bf16.msra.mxu0 %v360_v8 }
  0x20   :  { %241 = vmatpush.bf16.msra.mxu1 %v368_v13 }
  0x23   :  { %159 = vmatpush.bf16.msra.mxu0 %v359_v9 }
  0x24   :  { %242 = vmatpush.bf16.msra.mxu1 %v367_v14 }
  0x27   :  { %160 = vmatpush.bf16.msra.mxu0 %v358_v10 }
  0x28   :  { %243 = vmatpush.bf16.msra.mxu1 %v366_v15 }
  0x2b   :  { %161 = vmatpush.bf16.msra.mxu0 %v357_v11 }
  0x2c   :  { %244 = vmatpush.bf16.msra.mxu1 %v365_v16 }
  0x2e   :  { %162 = vmatmul.bf16.vlgmr.msra.gmra.mxu0 %v356_v12 }
  0xab   :  { %v163_v17 = vpop.f32.mrf.mxu0 }
  0xac   :  { %v164_v19 = vadd.f32 %v381_v18, %v163_v17 }
  0xae   :  { %v168_v22 = vmax.f32 %v164_v19, 0.0 }
  0xb3   :  { %v165_v20 = vpop.f32.mrf.mxu0 }
  0xb4   :  { %v166_v21 = vadd.f32 %v381_v18, %v165_v20 }
  0xb6   :  { %v169_v23 = vmax.f32 %v166_v21, 0.0 }
  0xb8   :  { %v170_v24 = vpack.c.bf16 %v169_v23, %v168_v22 }
  0xba   :  { %245 = vmatmul.bf16.vlgmr.msra.gmra.mxu1 %v170_v24 }
 0x137   :  { %v246_v26 = vpop.f32.mrf.mxu1 }
 0x138   :  { %v264_v27 = vadd.f32 %v382_v25, %v246_v26 }
 0x13a   :  { %266 = vst [vmem:[#allocation10] sm:$0xff] %v264_v27 }
 0x13f   :  { %v248_v28 = vpop.f32.mrf.mxu1 }
 0x140   :  { %v265_v29 = vadd.f32 %v382_v25, %v248_v28 }
 0x142   :  { %267 = vst [vmem:[#allocation10 + $0x8] sm:$0xff] %v265_v29 }
 0x143   :  { %280 = dma.vmem_to_hbm [thread:$0]  %s273_s15, 256, %s275_s3, [#allocation6], %s491_s18, %s491_s18, %s492_s19  }
 0x144   :  { %483 = dma.done.wait [#allocation6], 256  }
 0x145   :  { %484 = vsyncadd [#allocation6], 4294967040 }
 0x146   :  { %285 = vsyncpa [#allocation5], 1 }
 0x147   :  { %286 = vsyncpa [#allocation8], 1 }
 0x148   :  { %287 = vsyncpa [#allocation6], 1 }

</bundles_post_ra>
